<compile_context>
chip_gen: v7x
topology: tpu7x:2x2x1
jax: 0.10.0
libtpu: 0.0.40
codegen_flags: <defaults>
</compile_context>

<pallas_src>
import functools

import jax
import jax.numpy as jnp
from jax import lax
from jax.experimental import pallas as pl
from jax.experimental.pallas import tpu as pltpu


def se_kernel(x_ref, wc1_ref, wc2_ref, wg1_ref, wg2_ref, o_ref):
    # x_ref: (Bt, HW, C), native dtype, channels-last (lane-dense I/O).
    xb = x_ref[...]
    _, _, C = xb.shape
    nc = wc2_ref.shape[1]
    ctx_ch = C // nc

    # --- squeeze: global spatial sum (1/HW folded into wc1/wg1 by the wrapper) ---
    s = jnp.sum(xb.astype(jnp.float32), axis=1)                              # (Bt, C) f32

    # --- context attention: 1x1 conv -> ReLU -> 1x1 conv -> sigmoid ---
    h = jnp.maximum(jnp.dot(s, wc1_ref[...], preferred_element_type=jnp.float32), 0.0)
    ctx = jax.nn.sigmoid(
        jnp.dot(h, wc2_ref[...], preferred_element_type=jnp.float32))        # (Bt, nc)

    # --- channel attention: grouped 1x1 convs as block-diagonal dense matmuls ---
    g = jnp.maximum(jnp.dot(s, wg1_ref[...], preferred_element_type=jnp.float32), 0.0)
    ch = jax.nn.sigmoid(
        jnp.dot(g, wg2_ref[...], preferred_element_type=jnp.float32))        # (Bt, C)

    # --- replicate each context weight over its ctx_ch channel block ---
    # 0/1 expansion matrix built in-register from iota (no HBM operand / DMA).
    row = lax.broadcasted_iota(jnp.int32, (nc, C), 0) * ctx_ch
    col = lax.broadcasted_iota(jnp.int32, (nc, C), 1)
    expand = ((col >= row) & (col < row + ctx_ch)).astype(jnp.float32)        # (nc, C)
    ctx_full = jnp.dot(ctx, expand, preferred_element_type=jnp.float32)       # (Bt, C)

    att = (ctx_full * ch).astype(xb.dtype)                                    # (Bt, C)
    # Per-lane attention vector broadcast across sublanes (HW) -> cheap.
    o_ref[...] = xb * att[:, None, :]


def _make_block_diag(grouped_w, num_groups):
    """Torch-style grouped 1x1-conv weight (O, I/groups, 1, 1) -> dense block-diag (O, I)."""
    out_ch, in_pg = grouped_w.shape[0], grouped_w.shape[1]
    out_pg = out_ch // num_groups
    in_ch = in_pg * num_groups
    w2d = grouped_w[:, :, 0, 0]
    dense = jnp.zeros((out_ch, in_ch), jnp.float32)
    for gi in range(num_groups):
        dense = dense.at[gi * out_pg:(gi + 1) * out_pg,
                         gi * in_pg:(gi + 1) * in_pg].set(
            w2d[gi * out_pg:(gi + 1) * out_pg, :])
    return dense


def _choose_batch_tile(B, block_bytes_per_image, budget_bytes):
    """Largest divisor Bt of B whose double-buffered in+out blocks fit `budget_bytes`,
    preferring a grid of >= 2 steps so both v7x TensorCores get work."""
    divisors = [bt for bt in range(1, B + 1) if B % bt == 0]
    fitting = [bt for bt in divisors if 4 * bt * block_bytes_per_image <= budget_bytes]
    if not fitting:
        fitting = [1]
    multi_step = [bt for bt in fitting if B // bt >= 2]
    pool = multi_step if multi_step else fitting
    return max(pool)


def se_layer_pallas_nhwc(x_cl, w_ctx1, w_ctx2, w_ch1, w_ch2, *, reduction=4, num_context=6):
    """Core lane-dense kernel. x_cl: (B, HW, C), returns (B, HW, C) in x_cl.dtype."""
    B, HW, C = x_cl.shape
    mid = C // reduction
    assert C % 2 == 0, "channel must be even (channel // 2 conv)"
    assert C % reduction == 0, "channel must be divisible by reduction"
    assert C % num_context == 0, "channel must be divisible by num_context"
    assert mid % num_context == 0, "channel // reduction must be divisible by num_context"

    inv_hw = 1.0 / float(HW)
    # Plain 1x1 convs: pre-transpose so kernel computes y @ W^T; fold 1/HW of the
    # global average pool into the (linear, pre-ReLU) first-layer weights.
    wc1_t = w_ctx1[:, :, 0, 0].astype(jnp.float32).T * inv_hw                 # (C, C//2)
    wc2_t = w_ctx2[:, :, 0, 0].astype(jnp.float32).T                          # (C//2, nc)
    wg1_t = _make_block_diag(w_ch1.astype(jnp.float32), num_context).T * inv_hw   # (C, mid)
    wg2_t = _make_block_diag(w_ch2.astype(jnp.float32), num_context).T            # (mid, C)

    itemsize = jnp.dtype(x_cl.dtype).itemsize
    block_bytes = HW * C * itemsize
    bt = _choose_batch_tile(B, block_bytes, budget_bytes=16 * 1024 * 1024)
    grid = (B // bt,)

    w_bytes = 4 * (wc1_t.size + wc2_t.size + wg1_t.size + wg2_t.size)
    # Raise scoped VMEM above the v5e 16 MiB default; stay well under v7x's 64 MiB physical.
    vmem_need = 4 * bt * block_bytes + 2 * w_bytes + (4 << 20)
    vmem_limit = int(min(max(vmem_need, 32 << 20), 48 << 20))

    cost = pl.CostEstimate(
        flops=2 * B * (C * (C // 2) + (C // 2) * num_context
                       + C * mid + mid * C + num_context * C) + 2 * B * C * HW,
        transcendentals=B * (num_context + C),
        bytes_accessed=2 * B * HW * C * itemsize + int(w_bytes),
    )

    return pl.pallas_call(
        se_kernel,
        out_shape=jax.ShapeDtypeStruct((B, HW, C), x_cl.dtype),
        grid_spec=pltpu.PrefetchScalarGridSpec(
            num_scalar_prefetch=0,
            grid=grid,
            in_specs=[
                pl.BlockSpec((bt, HW, C), lambda b: (b, 0, 0)),
                pl.BlockSpec(wc1_t.shape, lambda b: (0, 0)),
                pl.BlockSpec(wc2_t.shape, lambda b: (0, 0)),
                pl.BlockSpec(wg1_t.shape, lambda b: (0, 0)),
                pl.BlockSpec(wg2_t.shape, lambda b: (0, 0)),
            ],
            out_specs=pl.BlockSpec((bt, HW, C), lambda b: (b, 0, 0)),
        ),
        compiler_params=pltpu.CompilerParams(
            dimension_semantics=("parallel",),
            vmem_limit_bytes=vmem_limit,
        ),
        cost_estimate=cost,
    )(x_cl, wc1_t, wc2_t, wg1_t, wg2_t)


@functools.partial(jax.jit, static_argnames=("reduction", "num_context"))
def se_layer_pallas(x, w_ctx1, w_ctx2, w_ch1, w_ch2, *, reduction=4, num_context=6):
    """PyTorch-layout (NCHW) entry point, output in x.dtype.

    The NCHW<->channels-last transposes below are layout plumbing only; an NHWC
    model should call se_layer_pallas_nhwc directly and skip them.
    """
    B, C, H, W = x.shape
    x_cl = jnp.transpose(x, (0, 2, 3, 1)).reshape(B, H * W, C)
    out_cl = se_layer_pallas_nhwc(x_cl, w_ctx1, w_ctx2, w_ch1, w_ch2,
                                  reduction=reduction, num_context=num_context)
    return jnp.transpose(out_cl.reshape(B, H, W, C), (0, 3, 1, 2))


def se_layer_ref(x, w_ctx1, w_ctx2, w_ch1, w_ch2, reduction=4, num_context=6):
    """Pure-JAX reference matching the PyTorch forward exactly (NCHW, f32)."""
    B, C, H, W = x.shape
    mid = C // reduction
    in_pg, out_pg = C // num_context, mid // num_context
    ctx_ch = C // num_context

    y = jnp.mean(x, axis=(2, 3))                                   # (B, C)
    h = jnp.maximum(y @ w_ctx1[:, :, 0, 0].T, 0.0)
    ctx = jax.nn.sigmoid(h @ w_ctx2[:, :, 0, 0].T)                 # (B, num_context)

    yg = y.reshape(B, num_context, in_pg)
    w1g = w_ch1[:, :, 0, 0].reshape(num_context, out_pg, in_pg)
    g = jnp.maximum(jnp.einsum('bgi,goi->bgo', yg, w1g), 0.0)      # (B, nc, out_pg)
    w2g = w_ch2[:, :, 0, 0].reshape(num_context, C // num_context, out_pg)
    ch = jax.nn.sigmoid(jnp.einsum('bgo,gco->bgc', g, w2g).reshape(B, C))

    ctx_full = jnp.repeat(ctx, ctx_ch, axis=1)                     # (B, C)
    att = ctx_full * ch
    return x * att[:, :, None, None]


if __name__ == "__main__":
    B, C, H, W = 2, 48, 16, 16
    reduction, num_context = 4, 6
    mid = C // reduction

    key = jax.random.PRNGKey(0)
    kx, k1, k2, k3, k4 = jax.random.split(key, 5)
    x = jax.random.normal(kx, (B, C, H, W), jnp.float32)

    # torch-style weight shapes (O, I/groups, 1, 1), deterministic init
    w_ctx1 = jax.random.normal(k1, (C // 2, C, 1, 1), jnp.float32) * 0.1
    w_ctx2 = jax.random.normal(k2, (num_context, C // 2, 1, 1), jnp.float32) * 0.1
    w_ch1 = jax.random.normal(k3, (mid, C // num_context, 1, 1), jnp.float32) * 0.1
    w_ch2 = jax.random.normal(k4, (C, mid // num_context, 1, 1), jnp.float32) * 0.1

    # --- f32 run, checked tightly against the pure-JAX reference ---
    out = se_layer_pallas(x, w_ctx1, w_ctx2, w_ch1, w_ch2,
                          reduction=reduction, num_context=num_context)
    out = jax.block_until_ready(out)
    ref = se_layer_ref(x, w_ctx1, w_ctx2, w_ch1, w_ch2, reduction, num_context)
    assert out.shape == (B, C, H, W) and out.dtype == x.dtype
    assert jnp.allclose(out, ref, atol=1e-4, rtol=1e-4), "f32 mismatch vs reference"

    # --- bf16 run: native-dtype I/O path (no forced f32 cast of the x stream) ---
    x_bf16 = x.astype(jnp.bfloat16)
    out_bf16 = jax.block_until_ready(
        se_layer_pallas(x_bf16, w_ctx1, w_ctx2, w_ch1, w_ch2,
                        reduction=reduction, num_context=num_context))
    assert out_bf16.dtype == jnp.bfloat16
    ref_bf16 = se_layer_ref(x_bf16.astype(jnp.float32), w_ctx1, w_ctx2, w_ch1, w_ch2,
                            reduction, num_context)
    assert jnp.allclose(out_bf16.astype(jnp.float32), ref_bf16, atol=5e-2, rtol=5e-2), \
        "bf16 mismatch vs reference"

    print("KERNEL_OK")
</pallas_src>

<mosaic_0001>
module attributes {stable_mosaic.version = 11 : i64} {
  func.func @se_kernel(%arg0: i32, %arg1: memref<1x256x48xf32, #tpu.memory_space<vmem>>, %arg2: memref<48x24xf32, #tpu.memory_space<vmem>>, %arg3: memref<24x6xf32, #tpu.memory_space<vmem>>, %arg4: memref<48x12xf32, #tpu.memory_space<vmem>>, %arg5: memref<12x48xf32, #tpu.memory_space<vmem>>, %arg6: memref<1x256x48xf32, #tpu.memory_space<vmem>>) attributes {dimension_semantics = [#tpu.dimension_semantics<parallel>], iteration_bounds = array<i64: 2>, scalar_prefetch = 0 : i64, scratch_operands = 0 : i64, tpu.core_type = #tpu.core_type<tc>, window_params = [{transform_indices = @transform_0, window_bounds = array<i64: 1, 256, 48>}, {pipeline_mode = #tpu.pipeline_mode<synchronous>, transform_indices = @transform_1, window_bounds = array<i64: 48, 24>}, {pipeline_mode = #tpu.pipeline_mode<synchronous>, transform_indices = @transform_2, window_bounds = array<i64: 24, 6>}, {pipeline_mode = #tpu.pipeline_mode<synchronous>, transform_indices = @transform_3, window_bounds = array<i64: 48, 12>}, {pipeline_mode = #tpu.pipeline_mode<synchronous>, transform_indices = @transform_4, window_bounds = array<i64: 12, 48>}, {transform_indices = @transform_5, window_bounds = array<i64: 1, 256, 48>}]} {
    %c0 = arith.constant 0 : index
    %c0_0 = arith.constant 0 : index
    %c0_1 = arith.constant 0 : index
    %0 = vector.load %arg1[%c0, %c0_0, %c0_1] : memref<1x256x48xf32, #tpu.memory_space<vmem>>, vector<1x256x48xf32>
    %cst = arith.constant dense<0.000000e+00> : vector<1x48xf32>
    %1 = vector.multi_reduction <add>, %0, %cst [1] : vector<1x256x48xf32> to vector<1x48xf32>
    %c0_2 = arith.constant 0 : index
    %c0_3 = arith.constant 0 : index
    %2 = vector.load %arg2[%c0_2, %c0_3] : memref<48x24xf32, #tpu.memory_space<vmem>>, vector<48x24xf32>
    %cst_4 = arith.constant dense<0.000000e+00> : vector<1x24xf32>
    %3 = tpu.matmul %1, %2, %cst_4 {dimension_numbers = #tpu.dot_dimension_numbers<[1], [0], [0], [1], [0, 0, 1, 1], [], []>} : vector<1x48xf32>, vector<48x24xf32>, vector<1x24xf32> -> vector<1x24xf32>
    %cst_5 = arith.constant 0.000000e+00 : f32
    %4 = vector.broadcast %cst_5 : f32 to vector<1x24xf32>
    %5 = arith.maximumf %3, %4 : vector<1x24xf32>
    %c0_6 = arith.constant 0 : index
    %c0_7 = arith.constant 0 : index
    %6 = vector.load %arg3[%c0_6, %c0_7] : memref<24x6xf32, #tpu.memory_space<vmem>>, vector<24x6xf32>
    %cst_8 = arith.constant dense<0.000000e+00> : vector<1x6xf32>
    %7 = tpu.matmul %5, %6, %cst_8 {dimension_numbers = #tpu.dot_dimension_numbers<[1], [0], [0], [1], [0, 0, 1, 1], [], []>} : vector<1x24xf32>, vector<24x6xf32>, vector<1x6xf32> -> vector<1x6xf32>
    %8 = arith.negf %7 : vector<1x6xf32>
    %9 = math.exp %8 : vector<1x6xf32>
    %cst_9 = arith.constant 1.000000e+00 : f32
    %10 = vector.broadcast %cst_9 : f32 to vector<1x6xf32>
    %11 = arith.addf %10, %9 : vector<1x6xf32>
    %12 = arith.divf %10, %11 : vector<1x6xf32>
    %c0_10 = arith.constant 0 : index
    %c0_11 = arith.constant 0 : index
    %13 = vector.load %arg4[%c0_10, %c0_11] : memref<48x12xf32, #tpu.memory_space<vmem>>, vector<48x12xf32>
    %cst_12 = arith.constant dense<0.000000e+00> : vector<1x12xf32>
    %14 = tpu.matmul %1, %13, %cst_12 {dimension_numbers = #tpu.dot_dimension_numbers<[1], [0], [0], [1], [0, 0, 1, 1], [], []>} : vector<1x48xf32>, vector<48x12xf32>, vector<1x12xf32> -> vector<1x12xf32>
    %cst_13 = arith.constant 0.000000e+00 : f32
    %15 = vector.broadcast %cst_13 : f32 to vector<1x12xf32>
    %16 = arith.maximumf %14, %15 : vector<1x12xf32>
    %c0_14 = arith.constant 0 : index
    %c0_15 = arith.constant 0 : index
    %17 = vector.load %arg5[%c0_14, %c0_15] : memref<12x48xf32, #tpu.memory_space<vmem>>, vector<12x48xf32>
    %cst_16 = arith.constant dense<0.000000e+00> : vector<1x48xf32>
    %18 = tpu.matmul %16, %17, %cst_16 {dimension_numbers = #tpu.dot_dimension_numbers<[1], [0], [0], [1], [0, 0, 1, 1], [], []>} : vector<1x12xf32>, vector<12x48xf32>, vector<1x48xf32> -> vector<1x48xf32>
    %19 = arith.negf %18 : vector<1x48xf32>
    %20 = math.exp %19 : vector<1x48xf32>
    %cst_17 = arith.constant 1.000000e+00 : f32
    %21 = vector.broadcast %cst_17 : f32 to vector<1x48xf32>
    %22 = arith.addf %21, %20 : vector<1x48xf32>
    %23 = arith.divf %21, %22 : vector<1x48xf32>
    %24 = tpu.iota {dimensions = array<i32: 0>} : vector<6x48xi32>
    %c8_i32 = arith.constant 8 : i32
    %25 = vector.broadcast %c8_i32 : i32 to vector<6x48xi32>
    %26 = arith.muli %24, %25 : vector<6x48xi32>
    %27 = tpu.iota {dimensions = array<i32: 1>} : vector<6x48xi32>
    %28 = arith.cmpi sge, %27, %26 : vector<6x48xi32>
    %c8_i32_18 = arith.constant 8 : i32
    %29 = vector.broadcast %c8_i32_18 : i32 to vector<6x48xi32>
    %30 = arith.addi %26, %29 : vector<6x48xi32>
    %31 = arith.cmpi slt, %27, %30 : vector<6x48xi32>
    %32 = arith.andi %28, %31 : vector<6x48xi1>
    %33 = arith.extui %32 : vector<6x48xi1> to vector<6x48xi32>
    %34 = arith.sitofp %33 : vector<6x48xi32> to vector<6x48xf32>
    %cst_19 = arith.constant dense<0.000000e+00> : vector<1x48xf32>
    %35 = tpu.matmul %12, %34, %cst_19 {dimension_numbers = #tpu.dot_dimension_numbers<[1], [0], [0], [1], [0, 0, 1, 1], [], []>} : vector<1x6xf32>, vector<6x48xf32>, vector<1x48xf32> -> vector<1x48xf32>
    %36 = arith.mulf %35, %23 : vector<1x48xf32>
    %37 = vector.shape_cast %36 : vector<1x48xf32> to vector<1x1x48xf32>
    %38 = vector.broadcast %37 : vector<1x1x48xf32> to vector<1x256x48xf32>
    %39 = arith.mulf %0, %38 : vector<1x256x48xf32>
    %c0_20 = arith.constant 0 : index
    %c0_21 = arith.constant 0 : index
    %c0_22 = arith.constant 0 : index
    %40 = vector.load %arg6[%c0_20, %c0_21, %c0_22] : memref<1x256x48xf32, #tpu.memory_space<vmem>>, vector<1x256x48xf32>
    tpu.vector_store %arg6[%c0_20, %c0_21, %c0_22], %39 {strides = array<i32>} : memref<1x256x48xf32, #tpu.memory_space<vmem>>, vector<1x256x48xf32>,
    return
  }
  func.func @transform_0(%arg0: i32) -> (i32, i32, i32) {
    %c0_i32 = arith.constant 0 : i32
    %c0_i32_0 = arith.constant 0 : i32
    %c0_i32_1 = arith.constant 0 : i32
    return %arg0, %c0_i32, %c0_i32_0 : i32, i32, i32
  }
  func.func @transform_1(%arg0: i32) -> (i32, i32) {
    %c0_i32 = arith.constant 0 : i32
    %c0_i32_0 = arith.constant 0 : i32
    %c0_i32_1 = arith.constant 0 : i32
    return %c0_i32, %c0_i32_0 : i32, i32
  }
  func.func @transform_2(%arg0: i32) -> (i32, i32) {
    %c0_i32 = arith.constant 0 : i32
    %c0_i32_0 = arith.constant 0 : i32
    %c0_i32_1 = arith.constant 0 : i32
    return %c0_i32, %c0_i32_0 : i32, i32
  }
  func.func @transform_3(%arg0: i32) -> (i32, i32) {
    %c0_i32 = arith.constant 0 : i32
    %c0_i32_0 = arith.constant 0 : i32
    %c0_i32_1 = arith.constant 0 : i32
    return %c0_i32, %c0_i32_0 : i32, i32
  }
  func.func @transform_4(%arg0: i32) -> (i32, i32) {
    %c0_i32 = arith.constant 0 : i32
    %c0_i32_0 = arith.constant 0 : i32
    %c0_i32_1 = arith.constant 0 : i32
    return %c0_i32, %c0_i32_0 : i32, i32
  }
  func.func @transform_5(%arg0: i32) -> (i32, i32, i32) {
    %c0_i32 = arith.constant 0 : i32
    %c0_i32_0 = arith.constant 0 : i32
    %c0_i32_1 = arith.constant 0 : i32
    return %arg0, %c0_i32, %c0_i32_0 : i32, i32, i32
  }
}

</mosaic_0001>

<bundles_post_ra>
// kernel: se_layer_pallas.1
= control target key start
LH: loop header
LB: loop body
LE: loop exit
PB: predicated region body
PF: predicated region fallthrough
CT: control target
= control target key end

     0   :  { %10 = vsyncpa [#allocation3], 0  ;;  %s1604_s0 = inlined_call_operand.vmem [shape: f32[2,256,48], index: 0, kind: input, shape index: {}]   ;;  %s1605_s1 = inlined_call_operand.vmem [shape: f32[48,24], index: 1, kind: input, shape index: {}]   ;;  %s1606_s2 = inlined_call_operand.vmem [shape: f32[24,6], index: 2, kind: input, shape index: {}]   ;;  %s1607_s3 = inlined_call_operand.vmem [shape: f32[48,12], index: 3, kind: input, shape index: {}]   ;;  %s1608_s4 = inlined_call_operand.vmem [shape: f32[12,48], index: 4, kind: input, shape index: {}]   ;;  %s1609_s5 = inlined_call_operand.hbm [shape: f32[2,256,48], index: 5, kind: output, shape index: {}]  }
   0x1   :  { %12 = vsyncpa [#allocation3 + $0x1], 0  ;;  %s1162_s18 = smov 0   ;;  %s1164_s19 = smov 0  }
   0x2   :  { %s1166_s20 = smov 0   ;;  %s1168_s21 = smov 0  }
   0x3 LB: > { %s1183_s22 = sadd.s32 4294967295, %s1123_s21   ;;  %s885_s23 = sadd.s32 4294967294, %s1123_s21   ;;  %s1123_s21 = sphi %s1168_s21, %s1615_s21   ;;  %s1119_s20 = sphi %s1166_s20, %s1614_s20   ;;  %s1115_s19 = sphi %s1164_s19, %s1613_s19   ;;  %s1111_s18 = sphi %s1162_s18, %s1612_s18  }
   0x4   : > { %s1187_s24 = sadd.s32 1, %s1123_s21   ;;  %s135_s25 = sadd.s32 1, %s1119_s20 }
   0x5   : > { %s132_s26 = ssub.s32 %s1123_s21, %s1187_s24  ;;  %p145_p0 = scmp.ne.s32.totalorder %s1119_s20, %s1115_s19 }
   0x6   : > { %p133_p1 = scmp.eq.s32.totalorder %s132_s26, 0  ;;  %p146_p2 = scmp.eq.s32.totalorder %s1183_s22, 1 }
   0x7   : > { %p151_p3 = scmp.ne.s32.totalorder %s1115_s19, %s1111_s18  ;;  %p152_p4 = scmp.eq.s32.totalorder %s885_s23, 1 }
   0x8   : > { %s1198_s27 = scalar_select %p133_p1, %s1119_s20, %s135_s25  }
   0x9   : > { %p1200_p5 = por %p146_p2, %p145_p0  ;;  %p1204_p6 = por %p152_p4, %p151_p3 }
   0xa   : > { %p888_p7 = scmp.ge.s32.totalorder %s1123_s21, 1  ;;  %p190_p8 = scmp.lt.s32.totalorder %s1123_s21, 3 }
   0xc   : > { %p191_p9 = pnand %p888_p7, %p190_p8 }
   0xd   : > { %v325_v0 = vld [vmem:[%s1605_s1] sm:$0xff] (!%p191_p9)  ;;  %v326_v1 = vld [vmem:[%s1605_s1 + $0x8] sm:$0xff] (!%p191_p9)  ;;  %v327_v2 = vld [vmem:[%s1605_s1 + $0x10] sm:$0xff] (!%p191_p9)  ;;  %v1125_v3 = vmov (!%p191_p9), 0.0|0.0   ;;  %vm1126_vm0 = vmmov (!%p191_p9), 0   ;;  %v1127_v6 = vmov (!%p191_p9), 0.0  }
   0xe   : > { %194 = sbr.rel (%p191_p9) target bundleno = 816 (0x330), region = 40  ;;  %983 = vmatprep.subr.bf16.mxu0 (!%p191_p9), %v1125_v3  ;;  %v984_v4 = vpack.c.bf16 (!%p191_p9), %v326_v1, %v325_v0  ;;  %v328_v5 = vld [vmem:[%s1605_s1 + $0x18] sm:$0xff] (!%p191_p9)  ;;  %944 = vmatprep.mubr.msk.f32.mxu0 (!%p191_p9), %vm1126_vm0, %v1127_v6  ;;  %p218_p10 = scmp.lt.s32.totalorder (!%p191_p9), %s1183_s22, 1  ;;  %v405_v7 = vld [vmem:[%s1606_s2] sm:$0xff] (!%p191_p9)  ;;  %v406_v8 = vld [vmem:[%s1606_s2 + $0x8] sm:$0xff] (!%p191_p9)  ;;  %vm255_vm1 = vcmask (!%p191_p9), 392192  }
   0xf   : > { %992 = vmatprep.subr.bf16.mxu1 (!%p191_p9), %v1125_v3  ;;  %953 = vmatprep.mubr.msk.f32.mxu1 (!%p191_p9), %vm1126_vm0, %v1127_v6  ;;  %v987_v9 = vpack.c.bf16 (!%p191_p9), %v328_v5, %v327_v2  ;;  %v993_v10 = vpack.c.bf16 (!%p191_p9), %v406_v8, %v405_v7  ;;  %v329_v11 = vld [vmem:[%s1605_s1 + $0x20] sm:$0xff] (!%p191_p9)  ;;  %v330_v12 = vld [vmem:[%s1605_s1 + $0x28] sm:$0xff] (!%p191_p9)  ;;  %vm408_vm2 = vcmask (!%p191_p9), 195584   ;;  %vm571_vm3 = vcmask (!%p191_p9), 1043456   ;;  %s215_s12 = sand.u32 (!%p191_p9), 1, %s1115_s19   ;;  %s908_s15 = sshll.u32 (!%p191_p9), %s1183_s22, 12 }
  0x10   : > { %985 = vmatpush3.bf16.msra.mxu0 (!%p191_p9), %v984_v4  ;;  %v990_v13 = vpack.c.bf16 (!%p191_p9), %v330_v12, %v329_v11  ;;  %vm1128_vm4 = vmmov (!%p191_p9), 1   ;;  %vm567_vm9 = vcmask (!%p191_p9), 97280   ;;  %vm666_vm10 = vcmask (!%p191_p9), 1045504   ;;  %s889_s13 = sshll.u32 (!%p191_p9), %s215_s12, 8  ;;  %s1529_s23 = scalar_lea.hbm (!%p191_p9), %s1609_s5, %s908_s15 }
  0x11   : > { %986 = vmatprep.subr.bf16.mxu0 (!%p191_p9), %v1125_v3  ;;  %994 = vmatpush3.bf16.msra.mxu1 (!%p191_p9), %v993_v10  ;;  %vm1006_vm5 = vmpackc.low (!%p191_p9), %vm571_vm3, %vm1128_vm4  ;;  %vm662_vm11 = vcmask (!%p191_p9), 48128   ;;  %s1466_s14 = scalar_lea.vmem (!%p191_p9), [#allocation2], %s889_s13  ;;  %s1563_s25 = scalar_lea.sflag (!%p191_p9), [#allocation3], %s215_s12 }
  0x12   : > { %951 = vmatprep.subr.mxu1 (!%p191_p9), %v1127_v6  ;;  %s823_s16 = sshll.u32 (!%p191_p9), %s1466_s14, 4  ;;  %s1531_s16 = int_to_ptr.vmem [resolvable:$true] %s823_s16 }
  0x13   : > { %s1061_s26 = scalar_lea.vmem (!%p191_p9), %s1531_s16, 4096 }
  0x14   : > { %988 = vmatpush3.bf16.msra.mxu0 (!%p191_p9), %v987_v9  ;;  %p1062_p11 = scmp.ne.s32.totalorder (!%p191_p9), %s1531_s16, %s1061_s26 }
  0x15   : > { %s219_s30 = scalar_select %p218_p10, %s1183_s22, 1  ;;  %989 = vmatprep.subr.bf16.mxu0 %v1125_v3 }
  0x16   : > { %p1063_p12 = pnand %p1062_p11, %p1200_p5 }
  0x17   : > { %s907_s6 = sshll.u32 %s219_s30, 8  ;;  %s1129_s30 = smov [#allocation2]  }
  0x18   : > { %s1247_s9 = scalar_lea.vmem %s1604_s0, %s907_s6  ;;  %991 = vmatpush3.bf16.msra.mxu0 %v990_v13  ;;  %p1064_p13 = pneg %p1063_p12 }
  0x19   : > { %v1251_v14 = vld [vmem:[%s1247_s9] sm:$0xff]  ;;  %v1254_v15 = vld [vmem:[%s1247_s9 + $0x8] sm:$0xff]  ;;  %v1257_v16 = vld [vmem:[%s1247_s9 + $0x10] sm:$0xff]  ;;  %1004 = vmatprep.subr.bf16.mxu0 %v1125_v3  ;;  %s1065_s6 = sshll.u32 %s1129_s30, 4  ;;  %s1066_s6 = int_to_ptr.vmem [resolvable:$false] %s1065_s6 }
  0x1a   : > { %v1260_v17 = vld [vmem:[%s1247_s9 + $0x18] sm:$0xff]  ;;  %v256_v18 = vsel %vm255_vm1, %v1251_v14, 0.0  ;;  %v257_v19 = vsel %vm255_vm1, %v1254_v15, 0.0  ;;  %v259_v20 = vsel %vm255_vm1, %v1257_v16, 0.0  ;;  %v1269_v21 = vld [vmem:[%s1247_s9 + $0x20] sm:$0xff]  ;;  %v1274_v24 = vld [vmem:[%s1247_s9 + $0x28] sm:$0xff]  ;;  %p1068_p0 = scmp.lt.s32.totalorder %s1531_s16, %s1066_s6 }
  0x1b   : > { %v258_v22 = vadd.f32 %v257_v19, %v256_v18  ;;  %v261_v23 = vsel %vm255_vm1, %v1260_v17, 0.0  ;;  %v263_v26 = vsel %vm255_vm1, %v1269_v21, 0.0  ;;  %v1280_v27 = vld [vmem:[%s1247_s9 + $0x30] sm:$0xff]  ;;  %v265_v29 = vsel %vm255_vm1, %v1274_v24, 0.0  ;;  %v1285_v30 = vld [vmem:[%s1247_s9 + $0x38] sm:$0xff]  ;;  %v1290_v33 = vld [vmem:[%s1247_s9 + $0x40] sm:$0xff] }
  0x1c   : > { %v267_v32 = vsel %vm255_vm1, %v1280_v27, 0.0  ;;  %v269_v35 = vsel %vm255_vm1, %v1285_v30, 0.0  ;;  %v1295_v36 = vld [vmem:[%s1247_s9 + $0x48] sm:$0xff]  ;;  %v271_v38 = vsel %vm255_vm1, %v1290_v33, 0.0  ;;  %v1300_v39 = vld [vmem:[%s1247_s9 + $0x50] sm:$0xff]  ;;  %v1305_v42 = vld [vmem:[%s1247_s9 + $0x58] sm:$0xff] }
  0x1d   : > { %v260_v25 = vadd.f32 %v259_v20, %v258_v22  ;;  %v273_v41 = vsel %vm255_vm1, %v1295_v36, 0.0  ;;  %v275_v44 = vsel %vm255_vm1, %v1300_v39, 0.0  ;;  %v1310_v45 = vld [vmem:[%s1247_s9 + $0x60] sm:$0xff]  ;;  %v277_v47 = vsel %vm255_vm1, %v1305_v42, 0.0  ;;  %v1315_v48 = vld [vmem:[%s1247_s9 + $0x68] sm:$0xff]  ;;  %v1320_v51 = vld [vmem:[%s1247_s9 + $0x70] sm:$0xff] }
  0x1e   : > { %v279_v50 = vsel %vm255_vm1, %v1310_v45, 0.0  ;;  %v281_v53 = vsel %vm255_vm1, %v1315_v48, 0.0  ;;  %v1325_v54 = vld [vmem:[%s1247_s9 + $0x78] sm:$0xff]  ;;  %v283_v56 = vsel %vm255_vm1, %v1320_v51, 0.0  ;;  %v1330_v57 = vld [vmem:[%s1247_s9 + $0x80] sm:$0xff]  ;;  %v1335_v60 = vld [vmem:[%s1247_s9 + $0x88] sm:$0xff] }
  0x1f   : > { %v262_v28 = vadd.f32 %v261_v23, %v260_v25  ;;  %v285_v59 = vsel %vm255_vm1, %v1325_v54, 0.0  ;;  %v287_v62 = vsel %vm255_vm1, %v1330_v57, 0.0  ;;  %v1340_v63 = vld [vmem:[%s1247_s9 + $0x90] sm:$0xff]  ;;  %v289_v1 = vsel %vm255_vm1, %v1335_v60, 0.0  ;;  %v1345_v2 = vld [vmem:[%s1247_s9 + $0x98] sm:$0xff]  ;;  %v1350_v7 = vld [vmem:[%s1247_s9 + $0xa0] sm:$0xff] }
  0x20   : > { %v291_v5 = vsel %vm255_vm1, %v1340_v63, 0.0  ;;  %v293_v9 = vsel %vm255_vm1, %v1345_v2, 0.0  ;;  %v1355_v10 = vld [vmem:[%s1247_s9 + $0xa8] sm:$0xff]  ;;  %v295_v12 = vsel %vm255_vm1, %v1350_v7, 0.0  ;;  %v1360_v13 = vld [vmem:[%s1247_s9 + $0xb0] sm:$0xff]  ;;  %v1365_v20 = vld [vmem:[%s1247_s9 + $0xb8] sm:$0xff] }
  0x21   : > { %v264_v31 = vadd.f32 %v263_v26, %v262_v28  ;;  %v297_v19 = vsel %vm255_vm1, %v1355_v10, 0.0  ;;  %v299_v23 = vsel %vm255_vm1, %v1360_v13, 0.0  ;;  %v1370_v25 = vld [vmem:[%s1247_s9 + $0xc0] sm:$0xff]  ;;  %v301_v28 = vsel %vm255_vm1, %v1365_v20, 0.0  ;;  %s1067_s7 = scalar_lea.vmem %s1066_s6, 8192 }
  0x22   : > { %p1069_p1 = scmp.lt.s32.totalorder %s1067_s7, %s1061_s26 }
  0x23   : > { %v266_v34 = vadd.f32 %v265_v29, %v264_v31  ;;  %v1375_v29 = vld [vmem:[%s1247_s9 + $0xc8] sm:$0xff] }
  0x24   : > { %p1070_p2 = por %p1069_p1, %p1068_p0 }
  0x25   : > { %v268_v37 = vadd.f32 %v267_v32, %v266_v34  ;;  %v303_v32 = vsel %vm255_vm1, %v1370_v25, 0.0  ;;  %v1380_v34 = vld [vmem:[%s1247_s9 + $0xd0] sm:$0xff] }
  0x26   : > { %p1071_p3 = pnand %p1070_p2, %p1064_p13 }
  0x27   : > { %v270_v40 = vadd.f32 %v269_v35, %v268_v37  ;;  %v305_v37 = vsel %vm255_vm1, %v1375_v29, 0.0 }
  0x29   : > { %v272_v43 = vadd.f32 %v271_v38, %v270_v40  ;;  %v1385_v38 = vld [vmem:[%s1247_s9 + $0xd8] sm:$0xff] }
  0x2b   : > { %v274_v46 = vadd.f32 %v273_v41, %v272_v43  ;;  %v307_v41 = vsel %vm255_vm1, %v1380_v34, 0.0  ;;  %v1390_v43 = vld [vmem:[%s1247_s9 + $0xe0] sm:$0xff] }
  0x2d   : > { %v276_v49 = vadd.f32 %v275_v44, %v274_v46  ;;  %v309_v46 = vsel %vm255_vm1, %v1385_v38, 0.0 }
  0x2f   : > { %v278_v52 = vadd.f32 %v277_v47, %v276_v49  ;;  %v1395_v47 = vld [vmem:[%s1247_s9 + $0xe8] sm:$0xff] }
  0x31   : > { %v280_v55 = vadd.f32 %v279_v50, %v278_v52  ;;  %v311_v50 = vsel %vm255_vm1, %v1390_v43, 0.0  ;;  %v1400_v52 = vld [vmem:[%s1247_s9 + $0xf0] sm:$0xff] }
  0x33   : > { %v282_v58 = vadd.f32 %v281_v53, %v280_v55  ;;  %v313_v55 = vsel %vm255_vm1, %v1395_v47, 0.0 }
  0x35   : > { %v284_v61 = vadd.f32 %v283_v56, %v282_v58  ;;  %v1405_v56 = vld [vmem:[%s1247_s9 + $0xf8] sm:$0xff] }
  0x37   : > { %v286_v0 = vadd.f32 %v285_v59, %v284_v61  ;;  %v315_v59 = vsel %vm255_vm1, %v1400_v52, 0.0 }
  0x39   : > { %v288_v4 = vadd.f32 %v287_v62, %v286_v0  ;;  %v317_v62 = vsel %vm255_vm1, %v1405_v56, 0.0 }
  0x3b   : > { %v290_v8 = vadd.f32 %v289_v1, %v288_v4 }
  0x3d   : > { %v292_v11 = vadd.f32 %v291_v5, %v290_v8 }
  0x3f   : > { %v294_v18 = vadd.f32 %v293_v9, %v292_v11 }
  0x41   : > { %v296_v22 = vadd.f32 %v295_v12, %v294_v18  ;;  %v407_v18 = vld [vmem:[%s1606_s2 + $0x10] sm:$0xff] }
  0x42   : > { %952 = vmatpush3.msra.mxu1 %v407_v18 }
  0x43   : > { %v298_v26 = vadd.f32 %v297_v19, %v296_v22  ;;  %995 = vmatprep.subr.bf16.mxu1 %v1125_v3  ;;  %v488_v19 = vld [vmem:[%s1607_s3] sm:$0xff]  ;;  %v489_v22 = vld [vmem:[%s1607_s3 + $0x8] sm:$0xff] }
  0x45   : > { %v300_v31 = vadd.f32 %v299_v23, %v298_v26  ;;  %v996_v26 = vpack.c.bf16 %v489_v22, %v488_v19 }
  0x47   : > { %v302_v35 = vadd.f32 %v301_v28, %v300_v31 }
  0x49   : > { %v304_v40 = vadd.f32 %v303_v32, %v302_v35  ;;  %v490_v32 = vld [vmem:[%s1607_s3 + $0x10] sm:$0xff]  ;;  %v491_v35 = vld [vmem:[%s1607_s3 + $0x18] sm:$0xff] }
  0x4b   : > { %v306_v44 = vadd.f32 %v305_v37, %v304_v40  ;;  %v999_v37 = vpack.c.bf16 %v491_v35, %v490_v32  ;;  %v492_v40 = vld [vmem:[%s1607_s3 + $0x20] sm:$0xff] }
  0x4d   : > { %v308_v49 = vadd.f32 %v307_v41, %v306_v44  ;;  %v493_v41 = vld [vmem:[%s1607_s3 + $0x28] sm:$0xff] }
  0x4e   : > { %v1002_v44 = vpack.c.bf16 %v493_v41, %v492_v40 }
  0x4f   : > { %v310_v53 = vadd.f32 %v309_v46, %v308_v49  ;;  %v565_v46 = vld [vmem:[%s1608_s4] sm:$0xff]  ;;  %v566_v49 = vld [vmem:[%s1608_s4 + $0x8] sm:$0xf] }
  0x51   : > { %v312_v58 = vadd.f32 %v311_v50, %v310_v53  ;;  %v1005_v50 = vpack.c.bf16 %v566_v49, %v565_v46  ;;  %v651_v53 = vlaneseq }
  0x53   : > { %v314_v61 = vadd.f32 %v313_v55, %v312_v58 }
  0x55   : > { %v316_v0 = vadd.f32 %v315_v59, %v314_v61 }
  0x57   : > { %v318_v1 = vadd.f32 %v317_v62, %v316_v0  ;;  %v655_v62 = vand.u32 127, %v651_v53 }
  0x59   : > { %v319_v4 = vrot.slane %v318_v1, 4 }
  0x5b   : > { %v320_v5 = vadd.f32 %v319_v4, %v318_v1 }
  0x5d   : > { %v321_v8 = vrot.slane %v320_v5, 2 }
  0x5f   : > { %v322_v9 = vadd.f32 %v321_v8, %v320_v5 }
  0x61   : > { %v323_v11 = vrot.slane %v322_v9, 1 }
  0x63   : > { %v324_v12 = vadd.f32 %v323_v11, %v322_v9 }
  0x65   : > { %945 = vmatmul.mubr.msk.f32.vlgmr.msra.gmra.mrb[0].mxu0 %vm255_vm1, %v324_v12 }
  0x66   : > { %975 = vmatprep.mubr.msk.f32.mxu0 %vm1126_vm0, %v1127_v6  ;;  %1007 = vmatpush3.bf16.msk.msra.mxu0 %vm1006_vm5, %v1005_v50 }
  0x67   : > { %978 = vmatprep.subr.mxu0 %v1127_v6 }
 0x138   : > { %v400_v23 = vpop.f32.mrb[0].mxu0 }
 0x139   : > { %v404_v28 = vmax.f32 %v400_v23, 0.0  ;;  %v946_v31 = vpop.f32.mrb[1].mxu0 }
 0x13b   : > { %954 = vmatmul.mubr.msk.f32.vlgmr.msra.gmra.mrb[0].mxu1 %vm408_vm2, %v404_v28 }
 0x13c   : > { %997 = vmatpush3.bf16.msra.mxu1 %v996_v26  ;;  %968 = vmatprep.mubr.msk.f32.mxu1 %vm1126_vm0, %v1127_v6 }
 0x13d   : > { %998 = vmatprep.subr.bf16.mxu1 %v1125_v3 }
 0x140   : > { %1000 = vmatpush3.bf16.msra.mxu1 %v999_v37 }
 0x141   : > { %1001 = vmatprep.subr.bf16.mxu1 %v1125_v3  ;;  %v652_v3 = vshrl.u32 %v651_v53, 7 }
 0x143   : > { %v653_v55 = vmul.u32 8, %v652_v3  ;;  %v743_v32 = vsub.s32 0, %v652_v3 }
 0x144   : > { %1003 = vmatpush3.bf16.msra.mxu1 %v1002_v44 }
 0x145   : > { %v657_v0 = vadd.s32 8, %v653_v55  ;;  %vm656_vm6 = vcmp.ge.s32.totalorder %v655_v62, %v653_v55 }
 0x147   : > { %969 = vmatmul.mubr.msk.f32.vlgmr.msra.gmra.mrb[2].mxu1 %vm255_vm1, %v324_v12  ;;  %vm658_vm7 = vcmp.lt.s32.totalorder %v655_v62, %v657_v0 }
 0x148   : > { %vm659_vm8 = vmand %vm656_vm6, %vm658_vm7 }
 0x149   : > { %v899_v9 = vsel %vm659_vm8, 1.0, %v1127_v6 }
 0x20e   : > { %v478_v58 = vpop.f32.mrb[0].mxu1 }
 0x20f   : > { %v894_v59 = vmul.f32 -1.442695, %v478_v58  ;;  %v955_v61 = vpop.f32.mrb[1].mxu1 }
 0x211   : > { %1053 = vpow2.f32 %v894_v59 }
 0x21a   : > { %v560_v1 = vpop.f32.mrb[2].mxu1 }
 0x21b   : > { %v1054_v4 = vpop.eup %1053  ;;  %v564_v5 = vmax.f32 %v560_v1, 0.0  ;;  %v970_v8 = vpop.f32.mrb[3].mxu1 }
 0x21c   : > { %v485_v11 = vadd.f32 1.0, %v1054_v4 }
 0x21d   : > { %976 = vmatmul.mubr.msk.f32.vlgmr.msra.gmra.mrb[2].mxu0 %vm567_vm9, %v564_v5 }
 0x21e   : > { %1055 = vrcp.f32 %v485_v11  ;;  %979 = vmatpush3.msk.msra.mxu0 %vm666_vm10, %v899_v9  ;;  %980 = vmatprep.mubr.msk.f32.mxu0 %vm1126_vm0, %v1127_v6 }
 0x228   : > { %v1056_v12 = vpop.eup %1055 }
 0x229   : > { %981 = vmatmul.mubr.msk.f32.vlgmr.msra.gmra.mrb[4].mxu0 %vm662_vm11, %v1056_v12 }
 0x2f0   : > { %v641_v18 = vpop.f32.mrb[2].mxu0 }
 0x2f1   : > { %v898_v19 = vmul.f32 -1.442695, %v641_v18  ;;  %v977_v22 = vpop.f32.mrb[3].mxu0 }
 0x2f3   : > { %1057 = vpow2.f32 %v898_v19 }
 0x2fc   : > { %v736_v23 = vpop.f32.mrb[4].mxu0 }
 0x2fd   : > { %v1058_v26 = vpop.eup %1057  ;;  %v982_v28 = vpop.f32.mrb[5].mxu0 }
 0x2fe   : > { %v648_v31 = vadd.f32 1.0, %v1058_v26 }
 0x300   : > { %1059 = vrcp.f32 %v648_v31 }
 0x30a   : > { %v1060_v35 = vpop.eup %1059 }
 0x30b   : > { %v740_v37 = vmul.f32 %v1060_v35, %v736_v23 }
 0x30d   : > { %v744_v6 = vrot.slane %v740_v37, %v743_v32 }
 0x30f   : > { %v745_v40 = vmul.f32 %v744_v6, %v1251_v14  ;;  %v746_v41 = vmul.f32 %v744_v6, %v1254_v15  ;;  %v747_v44 = vmul.f32 %v744_v6, %v1257_v16  ;;  %v748_v46 = vmul.f32 %v744_v6, %v1260_v17 }
 0x310   : > { %v749_v49 = vmul.f32 %v744_v6, %v1269_v21  ;;  %v750_v50 = vmul.f32 %v744_v6, %v1274_v24  ;;  %v751_v53 = vmul.f32 %v744_v6, %v1280_v27  ;;  %v752_v3 = vmul.f32 %v744_v6, %v1285_v30 }
 0x311   : > { %v753_v55 = vmul.f32 %v744_v6, %v1290_v33  ;;  %v754_v58 = vmul.f32 %v744_v6, %v1295_v36  ;;  %v755_v14 = vmul.f32 %v744_v6, %v1300_v39  ;;  %v756_v15 = vmul.f32 %v744_v6, %v1305_v42  ;;  %777 = vst.msk [vmem:[%s1466_s14] sm:$0xff] %vm255_vm1, %v745_v40 }
 0x312   : > { %778 = vst.msk [vmem:[%s1466_s14 + $0x8] sm:$0xff] %vm255_vm1, %v746_v41  ;;  %779 = vst.msk [vmem:[%s1466_s14 + $0x10] sm:$0xff] %vm255_vm1, %v747_v44  ;;  %v757_v16 = vmul.f32 %v744_v6, %v1310_v45  ;;  %v758_v17 = vmul.f32 %v744_v6, %v1315_v48  ;;  %v759_v21 = vmul.f32 %v744_v6, %v1320_v51 }
 0x313   : > { %780 = vst.msk [vmem:[%s1466_s14 + $0x18] sm:$0xff] %vm255_vm1, %v748_v46  ;;  %v760_v24 = vmul.f32 %v744_v6, %v1325_v54  ;;  %781 = vst.msk [vmem:[%s1466_s14 + $0x20] sm:$0xff] %vm255_vm1, %v749_v49  ;;  %v761_v27 = vmul.f32 %v744_v6, %v1330_v57  ;;  %v762_v30 = vmul.f32 %v744_v6, %v1335_v60 }
 0x314   : > { %782 = vst.msk [vmem:[%s1466_s14 + $0x28] sm:$0xff] %vm255_vm1, %v750_v50  ;;  %783 = vst.msk [vmem:[%s1466_s14 + $0x30] sm:$0xff] %vm255_vm1, %v751_v53  ;;  %v763_v33 = vmul.f32 %v744_v6, %v1340_v63  ;;  %v764_v36 = vmul.f32 %v744_v6, %v1345_v2  ;;  %v765_v39 = vmul.f32 %v744_v6, %v1350_v7 }
 0x315   : > { %784 = vst.msk [vmem:[%s1466_s14 + $0x38] sm:$0xff] %vm255_vm1, %v752_v3  ;;  %785 = vst.msk [vmem:[%s1466_s14 + $0x40] sm:$0xff] %vm255_vm1, %v753_v55  ;;  %v766_v42 = vmul.f32 %v744_v6, %v1355_v10  ;;  %v767_v45 = vmul.f32 %v744_v6, %v1360_v13  ;;  %v768_v48 = vmul.f32 %v744_v6, %v1365_v20 }
 0x316   : > { %786 = vst.msk [vmem:[%s1466_s14 + $0x48] sm:$0xff] %vm255_vm1, %v754_v58  ;;  %787 = vst.msk [vmem:[%s1466_s14 + $0x50] sm:$0xff] %vm255_vm1, %v755_v14  ;;  %v769_v51 = vmul.f32 %v744_v6, %v1370_v25  ;;  %v770_v54 = vmul.f32 %v744_v6, %v1375_v29  ;;  %v771_v57 = vmul.f32 %v744_v6, %v1380_v34 }
 0x317   : > { %788 = vst.msk [vmem:[%s1466_s14 + $0x58] sm:$0xff] %vm255_vm1, %v756_v15  ;;  %789 = vst.msk [vmem:[%s1466_s14 + $0x60] sm:$0xff] %vm255_vm1, %v757_v16  ;;  %v772_v60 = vmul.f32 %v744_v6, %v1385_v38  ;;  %v773_v63 = vmul.f32 %v744_v6, %v1390_v43  ;;  %v774_v2 = vmul.f32 %v744_v6, %v1395_v47 }
 0x318   : > { %790 = vst.msk [vmem:[%s1466_s14 + $0x68] sm:$0xff] %vm255_vm1, %v758_v17  ;;  %791 = vst.msk [vmem:[%s1466_s14 + $0x70] sm:$0xff] %vm255_vm1, %v759_v21  ;;  %v775_v7 = vmul.f32 %v744_v6, %v1400_v52  ;;  %v776_v10 = vmul.f32 %v744_v6, %v1405_v56 }
 0x319   : > { %792 = vst.msk [vmem:[%s1466_s14 + $0x78] sm:$0xff] %vm255_vm1, %v760_v24  ;;  %793 = vst.msk [vmem:[%s1466_s14 + $0x80] sm:$0xff] %vm255_vm1, %v761_v27 }
 0x31a   : > { %794 = vst.msk [vmem:[%s1466_s14 + $0x88] sm:$0xff] %vm255_vm1, %v762_v30  ;;  %795 = vst.msk [vmem:[%s1466_s14 + $0x90] sm:$0xff] %vm255_vm1, %v763_v33 }
 0x31b   : > { %796 = vst.msk [vmem:[%s1466_s14 + $0x98] sm:$0xff] %vm255_vm1, %v764_v36  ;;  %797 = vst.msk [vmem:[%s1466_s14 + $0xa0] sm:$0xff] %vm255_vm1, %v765_v39 }
 0x31c   : > { %798 = vst.msk [vmem:[%s1466_s14 + $0xa8] sm:$0xff] %vm255_vm1, %v766_v42  ;;  %799 = vst.msk [vmem:[%s1466_s14 + $0xb0] sm:$0xff] %vm255_vm1, %v767_v45 }
 0x31d   : > { %800 = vst.msk [vmem:[%s1466_s14 + $0xb8] sm:$0xff] %vm255_vm1, %v768_v48  ;;  %801 = vst.msk [vmem:[%s1466_s14 + $0xc0] sm:$0xff] %vm255_vm1, %v769_v51 }
 0x31e   : > { %802 = vst.msk [vmem:[%s1466_s14 + $0xc8] sm:$0xff] %vm255_vm1, %v770_v54  ;;  %803 = vst.msk [vmem:[%s1466_s14 + $0xd0] sm:$0xff] %vm255_vm1, %v771_v57 }
 0x31f   : > { %804 = vst.msk [vmem:[%s1466_s14 + $0xd8] sm:$0xff] %vm255_vm1, %v772_v60  ;;  %805 = vst.msk [vmem:[%s1466_s14 + $0xe0] sm:$0xff] %vm255_vm1, %v773_v63 }
 0x320   : > { %806 = vst.msk [vmem:[%s1466_s14 + $0xe8] sm:$0xff] %vm255_vm1, %v774_v2  ;;  %807 = vst.msk [vmem:[%s1466_s14 + $0xf0] sm:$0xff] %vm255_vm1, %v775_v7 }
 0x321   : > { %808 = vst.msk [vmem:[%s1466_s14 + $0xf8] sm:$0xff] %vm255_vm1, %v776_v10 }
 0x322   : > { %1074 = shalt.err (!%p1071_p3)
}
 0x323   : > { %s1075_s8 = scalar_lea.hbm %s1529_s23, 4096  ;;  %s1079_s11 = scalar_lea.hbm %s1609_s5, 8192 }
 0x324   : > { %p1076_p4 = scmp.ne.s32.totalorder %s1529_s23, %s1075_s8  ;;  %p1080_p9 = scmp.lt.u32.totalorder %s1529_s23, %s1609_s5 }
 0x325   : > { %p1081_p10 = scmp.lt.u32.totalorder %s1079_s11, %s1075_s8  ;;  %p1083_p12 = scmp.lt.u32.totalorder %s1075_s8, %s1529_s23 }
 0x326   : > { %p1077_p7 = pnand %p1076_p4, %p1200_p5 }
 0x327   : > { %p1082_p11 = por %p1081_p10, %p1080_p9 }
 0x328   : > { %p1078_p8 = pneg %p1077_p7 }
 0x329   : > { %p1084_p13 = por %p1083_p12, %p1082_p11 }
 0x32b   : > { %p1085_p0 = pnand %p1084_p13, %p1078_p8 }
 0x32d   : > { %1088 = shalt.err (!%p1085_p0)
}
 0x32e   : > { %s1130_s14 = smov 128   ;;  %s1131_s15 = smov 8  }
 0x32f   : > { %1008 = dma.vmem_to_hbm [thread:$0]  (%p1200_p5), %s1531_s16, 4096, %s1529_s23, %s1563_s25, %s1130_s14, %s1130_s14, %s1131_s15  }
 0x330 PF: > { %p1014_p1 = scmp.ge.s32.totalorder %s1123_s21, 2  ;;  %s838_s22 = sand.u32 1, %s1111_s18  }
 0x331   : > { %s839_s17 = scalar_lea.sflag [#allocation3], %s838_s22 }
 0x332   : > { %p1011_p2 = pnand %p1014_p1, %p1204_p6 }
 0x334   : > { %1106 = dma.done.wait (!%p1011_p2), %s839_s17, 4096  }
 0x335   : > { %1108 = vsyncadd (!%p1011_p2), %s839_s17, 4294963200  ;;  %p15_p3 = scmp.ge.s32.totalorder %s1187_s24, 4   ;;  %s1612_s18 = smov %s1115_s19 }
 0x336   : > { %s1613_s19 = smov %s1119_s20  ;;  %s1614_s20 = smov %s1198_s27 }
 0x337   : > { %s1615_s21 = smov %s1187_s24  ;;  %17 = sbr.rel (!%p15_p3) target bundleno = 3 (0x3), region = 75 }
 0x33e   :  { %844 = vsyncpa [#allocation3], 1 }
 0x33f   :  { %846 = vsyncpa [#allocation3 + $0x1], 1 }

</bundles_post_ra>
